<compile_context>
chip_gen: v5e
topology: v5e:2x2
jax: 0.10.0
libtpu: 0.0.40
codegen_flags: <defaults>
</compile_context>

<pallas_src>
import functools

import jax
import jax.numpy as jnp
from jax import lax
from jax.experimental import pallas as pl
from jax.experimental.pallas import tpu as pltpu

EPS = 1e-5  # PyTorch BatchNorm1d default


# ---------------------------------------------------------------------------
# small helpers
# ---------------------------------------------------------------------------
def _round_up(x, m):
    return (x + m - 1) // m * m


def _vmem_limit_bytes():
    """Scoped-VMEM limit: ~3/4 of physical (v5e/v6e 128 MiB, v7x 64 MiB), capped at
    96 MiB, with a conservative 48 MiB fallback if the hardware query is unavailable."""
    cap = 64 * 1024 * 1024
    try:
        cap = int(pltpu.get_tpu_info().vmem_capacity_bytes)
    except Exception:
        pass
    return int(max(min(cap * 3 // 4, 96 * 1024 * 1024), 32 * 1024 * 1024))


def _const_spec(block_shape, index_map):
    """BlockSpec for operands whose block index never changes across the grid
    (weights / BN params): single-buffered so they are not duplicated in VMEM."""
    try:
        return pl.BlockSpec(block_shape, index_map, pipeline_mode=pl.Buffered(1))
    except Exception:  # older jax without pipeline_mode -> default double buffering
        return pl.BlockSpec(block_shape, index_map)


# ---------------------------------------------------------------------------
# in-kernel building blocks
# ---------------------------------------------------------------------------
def _finite_flag(x):
    """(1, 1) f32: 1.0 iff every element of x is finite (NaN / +-inf -> 0.0)."""
    finite = (jnp.abs(x) < jnp.float32(jnp.inf)).astype(jnp.float32)
    f = jnp.min(finite, axis=0, keepdims=True)
    return jnp.min(f, axis=1, keepdims=True)


def _seq_pos(rows, L):
    """Position within each length-L sequence for every row of a chunk (rows % L == 0)."""
    return lax.broadcasted_iota(jnp.int32, (rows, 1), 0) % L


def _conv1_taps(x, w1_ref, pos, L):
    """Conv1d(k=3, padding=1) over whole sequences packed row-wise.
    x: (R, Cin) f32, R a multiple of L; w1_ref: (3, Cin, Hp) bf16 (tap, in, out).
    K = 3*Cin is tiny and not 128-aligned, so the taps are three small accumulated
    MXU dots (no non-aligned lane concat).  Rolls wrap only at rows that are masked
    to zero anyway (sequence edges coincide with chunk edges)."""
    R = x.shape[0]
    xm = jnp.where(pos == 0, 0.0, pltpu.roll(x, shift=1, axis=0))          # x[l-1]
    xp = jnp.where(pos == L - 1, 0.0, pltpu.roll(x, shift=R - 1, axis=0))  # x[l+1]
    y = jnp.dot(xm.astype(jnp.bfloat16), w1_ref[0], preferred_element_type=jnp.float32)
    y = y + jnp.dot(x.astype(jnp.bfloat16), w1_ref[1], preferred_element_type=jnp.float32)
    y = y + jnp.dot(xp.astype(jnp.bfloat16), w1_ref[2], preferred_element_type=jnp.float32)
    return y                                                               # (R, Hp) f32


def _conv2_im2col(h, w2_ref, pos, L):
    """Conv1d(k=3, padding=1) over Hp (128-aligned) channels as ONE fused-tap MXU
    matmul with K = 3*Hp.  h: (R, Hp) f32 -> (R, Hp) f32."""
    R = h.shape[0]
    hm = jnp.where(pos == 0, 0.0, pltpu.roll(h, shift=1, axis=0))
    hp = jnp.where(pos == L - 1, 0.0, pltpu.roll(h, shift=R - 1, axis=0))
    z = jnp.concatenate(
        [hm.astype(jnp.bfloat16), h.astype(jnp.bfloat16), hp.astype(jnp.bfloat16)],
        axis=-1)                                                           # (R, 3*Hp) bf16
    return jnp.dot(z, w2_ref[...], preferred_element_type=jnp.float32)


# ---------------------------------------------------------------------------
# fused single-call kernel (small problems: everything stays in VMEM)
# ---------------------------------------------------------------------------
def _fused_kernel(x_ref, w1_ref, w2_ref, out_ref, ok_ref, *, B, L, Hp):
    N = B * L
    inv_n = 1.0 / float(N)
    x = x_ref[...]                                                         # (N, Cin) f32
    ok_ref[...] = _finite_flag(x)
    pos = _seq_pos(N, L)

    # Conv biases are omitted: training-mode BatchNorm (gamma=1, beta=0) subtracts the
    # batch mean, which cancels any per-channel constant exactly.
    y1 = _conv1_taps(x, w1_ref, pos, L)
    m1 = jnp.sum(y1, axis=0, keepdims=True) * inv_n
    v1 = jnp.maximum(jnp.sum(y1 * y1, axis=0, keepdims=True) * inv_n - m1 * m1, 0.0)
    h1 = jnp.maximum((y1 - m1) * lax.rsqrt(v1 + EPS), 0.0)

    y2 = _conv2_im2col(h1, w2_ref, pos, L)
    m2 = jnp.sum(y2, axis=0, keepdims=True) * inv_n
    v2 = jnp.maximum(jnp.sum(y2 * y2, axis=0, keepdims=True) * inv_n - m2 * m2, 0.0)
    h2 = jnp.maximum((y2 - m2) * lax.rsqrt(v2 + EPS), 0.0)

    out_ref[...] = jnp.mean(h2.reshape(B, L, Hp), axis=1)                  # (B, Hp)


# ---------------------------------------------------------------------------
# 3-pass pipelined kernels (training-mode BN => two global sync points)
# ---------------------------------------------------------------------------
def _pass1_stats_kernel(x_ref, w1_ref, st_ref, *, L):
    """conv1 on one chunk of whole sequences; emit per-chunk BN1 partials only.
    y1 is NOT written to HBM (pass 2 recomputes it; the K=3*Cin matmul is far cheaper
    than a (N, Hp) f32 round trip).  st rows: 0 = sum, 1 = sumsq, 2 = finite flag."""
    x = x_ref[...]
    Hp = st_ref.shape[-1]
    pos = _seq_pos(x.shape[0], L)
    y1 = _conv1_taps(x, w1_ref, pos, L)
    s = jnp.sum(y1, axis=0, keepdims=True)
    q = jnp.sum(y1 * y1, axis=0, keepdims=True)
    ok = _finite_flag(x) + jnp.zeros((1, Hp), jnp.float32)
    st_ref[...] = jnp.concatenate([s, q, ok], axis=0)                      # (3, Hp)


def _pass2_conv2_kernel(x_ref, w1_ref, bn1_ref, w2_ref, y2_ref, st_ref, *, L):
    """Recompute conv1, apply BN1 + ReLU (mean/rsqrt precomputed in the wrapper), conv2.
    y2 goes to HBM as bf16 (halves the dominant write+read volume); BN2 partials are
    accumulated from the f32 values before the cast."""
    x = x_ref[...]
    pos = _seq_pos(x.shape[0], L)
    y1 = _conv1_taps(x, w1_ref, pos, L)
    h1 = jnp.maximum((y1 - bn1_ref[0:1, :]) * bn1_ref[1:2, :], 0.0)
    y2 = _conv2_im2col(h1, w2_ref, pos, L)
    y2_ref[...] = y2.astype(jnp.bfloat16)
    s = jnp.sum(y2, axis=0, keepdims=True)
    q = jnp.sum(y2 * y2, axis=0, keepdims=True)
    st_ref[...] = jnp.concatenate([s, q], axis=0)                          # (2, Hp)


def _pass3_mean_kernel(y2_ref, bn2_ref, out_ref, *, L):
    """BN2 + ReLU + mean over the length axis for bt whole sequences per grid step."""
    y2 = y2_ref[...].astype(jnp.float32)
    R, Hp = y2.shape
    h2 = jnp.maximum((y2 - bn2_ref[0:1, :]) * bn2_ref[1:2, :], 0.0)
    out_ref[...] = jnp.mean(h2.reshape(R // L, L, Hp), axis=1, keepdims=True)


# ---------------------------------------------------------------------------
# wrapper
# ---------------------------------------------------------------------------
def _prep_weights(w1, w2, Hp):
    """PyTorch (O, I, K) conv weights -> MXU-friendly bf16 layouts; output (and conv2
    input) channels zero-padded to Hp so every (rows, Hp) store is lane-dense."""
    H, Cin, _ = w1.shape
    w1_taps = jnp.transpose(w1, (2, 1, 0))                                 # (3, Cin, H)
    w1_taps = jnp.pad(w1_taps, ((0, 0), (0, 0), (0, Hp - H))).astype(jnp.bfloat16)
    w2_taps = jnp.transpose(w2, (2, 1, 0))                                 # (3, H, H)
    w2_taps = jnp.pad(w2_taps, ((0, 0), (0, Hp - H), (0, Hp - H)))
    w2_flat = w2_taps.reshape(3 * Hp, Hp).astype(jnp.bfloat16)             # row = k*Hp + i
    return w1_taps, w2_flat


def _pick_bt(B, L, Cin, Hp, vmem_limit, max_bt=None):
    """Whole sequences per grid step for the 3-pass path.  Chunk boundaries coincide
    with sequence boundaries (k=3 conv needs no halo); bt*L is kept a multiple of 8
    (sublane tiling) unless one chunk covers the whole batch."""
    bytes_per_row = 18 * Hp + 16 * Cin + 64            # approx pass-2 working set / row
    w_bytes = 2 * (3 * Cin * Hp + 3 * Hp * Hp)
    budget = max(vmem_limit - w_bytes - (4 << 20), 2 << 20)
    cap = max(int(budget // (bytes_per_row * L)), 1)
    if max_bt is not None:
        cap = min(cap, max_bt)
    cap = min(cap, B)
    for bt in range(cap, 0, -1):
        if B % bt:
            continue
        if (bt * L) % 8 != 0 and bt != B:
            continue
        return bt
    # TODO(synk): L-axis tiling with a 1-row halo when L is not sublane-aligned.
    return B


@functools.partial(jax.jit, static_argnames=("force_multipass", "max_bt"))
def _cnn_encoder_forward(x, w1, w2, force_multipass=False, max_bt=None):
    """x: (B, L, Cin) f32; w1: (H, Cin, 3), w2: (H, H, 3) in PyTorch Conv1d layout.
    Returns (out (B, H) f32, finite_flag (1, 1) f32 == 1.0 iff all inputs finite)."""
    B, L, Cin = x.shape
    H = w1.shape[0]
    Hp = _round_up(H, 128)                             # lane-dense channel dim
    N = B * L
    f32 = jnp.float32
    vmem_limit = _vmem_limit_bytes()

    w1_taps, w2_flat = _prep_weights(w1, w2, Hp)
    x_flat = x.reshape(N, Cin)

    # Small-problem fast path: everything (x, y1, h1, im2col, y2) stays in VMEM, one
    # pallas_call, no intermediate HBM round trips and no pipeline ramp.
    est_bytes = N * (18 * Hp + 16 * Cin + 64) + 2 * (3 * Cin * Hp + 3 * Hp * Hp)
    if not force_multipass and est_bytes < min(vmem_limit // 2, 24 << 20):
        out_p, ok = pl.pallas_call(
            functools.partial(_fused_kernel, B=B, L=L, Hp=Hp),
            out_shape=(jax.ShapeDtypeStruct((B, Hp), f32),
                       jax.ShapeDtypeStruct((1, 1), f32)),
            compiler_params=pltpu.CompilerParams(vmem_limit_bytes=vmem_limit),
        )(x_flat, w1_taps, w2_flat)
        return out_p[:, :H], ok

    bt = _pick_bt(B, L, Cin, Hp, vmem_limit, max_bt)
    Rt = bt * L
    G = N // Rt
    inv_n = 1.0 / float(N)

    def params(sem):
        return pltpu.CompilerParams(dimension_semantics=sem, vmem_limit_bytes=vmem_limit)

    # ---- pass 1: conv1 -> per-chunk (sum, sumsq, finite) partials (no y1 round trip).
    # Per-chunk partial outputs (not a revisited accumulator) keep the axis "parallel"
    # so v7x's two TensorCores can split the pass; reduced by a tiny XLA sum below.
    stats1 = pl.pallas_call(
        functools.partial(_pass1_stats_kernel, L=L),
        grid=(G,),
        in_specs=[
            pl.BlockSpec((Rt, Cin), lambda i: (i, 0)),
            _const_spec((3, Cin, Hp), lambda i: (0, 0, 0)),
        ],
        out_specs=pl.BlockSpec((None, 3, Hp), lambda i: (i, 0, 0)),
        out_shape=jax.ShapeDtypeStruct((G, 3, Hp), f32),
        compiler_params=params(("parallel",)),
    )(x_flat, w1_taps)

    s1 = jnp.sum(stats1[:, 0, :], axis=0, keepdims=True)
    q1 = jnp.sum(stats1[:, 1, :], axis=0, keepdims=True)
    ok = jnp.min(stats1[:, 2, :]).reshape(1, 1)
    m1 = s1 * inv_n
    # NOTE: single-pass variance E[x^2]-mean^2 in f32; fine at these sizes, consider a
    # shifted / Welford accumulation if B*L becomes very large.
    v1 = jnp.maximum(q1 * inv_n - m1 * m1, 0.0)
    bn1 = jnp.concatenate([m1, lax.rsqrt(v1 + EPS)], axis=0)               # (2, Hp)

    # ---- pass 2: recompute conv1, BN1 + ReLU, conv2 -> y2 (bf16) + per-chunk partials.
    y2, stats2 = pl.pallas_call(
        functools.partial(_pass2_conv2_kernel, L=L),
        grid=(G,),
        in_specs=[
            pl.BlockSpec((Rt, Cin), lambda i: (i, 0)),
            _const_spec((3, Cin, Hp), lambda i: (0, 0, 0)),
            _const_spec((2, Hp), lambda i: (0, 0)),
            _const_spec((3 * Hp, Hp), lambda i: (0, 0)),
        ],
        out_specs=(
            pl.BlockSpec((Rt, Hp), lambda i: (i, 0)),
            pl.BlockSpec((None, 2, Hp), lambda i: (i, 0, 0)),
        ),
        out_shape=(
            jax.ShapeDtypeStruct((N, Hp), jnp.bfloat16),
            jax.ShapeDtypeStruct((G, 2, Hp), f32),
        ),
        compiler_params=params(("parallel",)),
    )(x_flat, w1_taps, bn1, w2_flat)

    s2 = jnp.sum(stats2[:, 0, :], axis=0, keepdims=True)
    q2 = jnp.sum(stats2[:, 1, :], axis=0, keepdims=True)
    m2 = s2 * inv_n
    v2 = jnp.maximum(q2 * inv_n - m2 * m2, 0.0)
    bn2 = jnp.concatenate([m2, lax.rsqrt(v2 + EPS)], axis=0)               # (2, Hp)

    # ---- pass 3: BN2 + ReLU + mean over the length axis.
    out3 = pl.pallas_call(
        functools.partial(_pass3_mean_kernel, L=L),
        grid=(G,),
        in_specs=[
            pl.BlockSpec((Rt, Hp), lambda i: (i, 0)),
            _const_spec((2, Hp), lambda i: (0, 0)),
        ],
        out_specs=pl.BlockSpec((bt, 1, Hp), lambda i: (i, 0, 0)),
        out_shape=jax.ShapeDtypeStruct((B, 1, Hp), f32),
        compiler_params=params(("parallel",)),
    )(y2, bn2)

    return out3.reshape(B, Hp)[:, :H], ok


def cnn_encoder_pallas(x, w1, b1=None, w2=None, b2=None, *,
                       check_finite=False, force_multipass=False, max_bt=None):
    """Forward pass of CNNEncoder.  x: (B, L, Cin) f32; weights in PyTorch layout.
    b1/b2 are accepted for API parity but are mathematically cancelled by the
    training-mode BatchNorm (gamma=1, beta=0) mean subtraction; if eval-mode /
    affine BN were ever used, the biases would need to be re-introduced."""
    out, ok = _cnn_encoder_forward(x, w1, w2,
                                   force_multipass=force_multipass, max_bt=max_bt)
    if check_finite:
        # Opt-in: forces a device->host sync; keep off the hot path.
        if float(ok[0, 0]) != 1.0:
            raise ValueError("Non-finite input detected")
    return out


# ---------------------------------------------------------------------------
# pure-JAX reference mirroring the PyTorch forward (training-mode BN)
# ---------------------------------------------------------------------------
def cnn_encoder_ref(x, w1, b1, w2, b2):
    x_ncl = jnp.transpose(x, (0, 2, 1))            # (B, Cin, L)
    dn = ('NCH', 'OIH', 'NCH')

    def bn_relu(y):
        m = jnp.mean(y, axis=(0, 2), keepdims=True)
        v = jnp.mean((y - m) ** 2, axis=(0, 2), keepdims=True)
        return jnp.maximum((y - m) * lax.rsqrt(v + EPS), 0.0)

    y = lax.conv_general_dilated(x_ncl, w1, (1,), 'SAME', dimension_numbers=dn)
    y = bn_relu(y + b1.reshape(1, -1, 1))
    y = lax.conv_general_dilated(y, w2, (1,), 'SAME', dimension_numbers=dn)
    y = bn_relu(y + b2.reshape(1, -1, 1))
    return jnp.mean(y, axis=2)                     # (B, H)


if __name__ == "__main__":
    B, L, INPUT_DIM, HIDDEN_DIM = 2, 8, 4, 32

    key = jax.random.PRNGKey(0)
    kx, kw1, kb1, kw2, kb2, kx2 = jax.random.split(key, 6)

    x = jax.random.normal(kx, (B, L, INPUT_DIM), dtype=jnp.float32)

    # Conv1d weights: kaiming_normal_(mode='fan_out', nonlinearity='relu')
    std = (2.0 / (HIDDEN_DIM * 3)) ** 0.5
    w1 = std * jax.random.normal(kw1, (HIDDEN_DIM, INPUT_DIM, 3), dtype=jnp.float32)
    w2 = std * jax.random.normal(kw2, (HIDDEN_DIM, HIDDEN_DIM, 3), dtype=jnp.float32)
    # Conv1d bias default init: U(-1/sqrt(fan_in), 1/sqrt(fan_in))
    bnd1 = 1.0 / ((INPUT_DIM * 3) ** 0.5)
    bnd2 = 1.0 / ((HIDDEN_DIM * 3) ** 0.5)
    b1 = jax.random.uniform(kb1, (HIDDEN_DIM,), minval=-bnd1, maxval=bnd1, dtype=jnp.float32)
    b2 = jax.random.uniform(kb2, (HIDDEN_DIM,), minval=-bnd2, maxval=bnd2, dtype=jnp.float32)
    # BatchNorm1d: weight=1, bias=0 (folded out of the kernel)

    # Small shape -> fully fused single pallas_call path.
    out = jax.block_until_ready(cnn_encoder_pallas(x, w1, b1, w2, b2))
    ref = jax.block_until_ready(cnn_encoder_ref(x, w1, b1, w2, b2))
    assert out.shape == (B, HIDDEN_DIM)
    # bf16 MXU operands (f32 accumulation) => tolerance sized for bf16 rounding.
    assert bool(jnp.allclose(out, ref, rtol=2e-2, atol=2e-2)), "fused path mismatch vs reference"

    # Also exercise the 3-pass pipelined path with multiple chunks (bt < B, G > 1).
    B2, L2 = 4, 16
    x2 = jax.random.normal(kx2, (B2, L2, INPUT_DIM), dtype=jnp.float32)
    out2 = jax.block_until_ready(
        cnn_encoder_pallas(x2, w1, b1, w2, b2, force_multipass=True, max_bt=2))
    ref2 = jax.block_until_ready(cnn_encoder_ref(x2, w1, b1, w2, b2))
    assert out2.shape == (B2, HIDDEN_DIM)
    assert bool(jnp.allclose(out2, ref2, rtol=2e-2, atol=2e-2)), "multi-pass mismatch vs reference"

    print("KERNEL_OK")
</pallas_src>

<mosaic_0001>
module attributes {stable_mosaic.version = 11 : i64} {
  func.func @_fused_kernel(%arg0: memref<16x4xf32, #tpu.memory_space<vmem>>, %arg1: memref<3x4x128xbf16, #tpu.memory_space<vmem>>, %arg2: memref<384x128xbf16, #tpu.memory_space<vmem>>, %arg3: memref<2x128xf32, #tpu.memory_space<vmem>>, %arg4: memref<1x1xf32, #tpu.memory_space<vmem>>) attributes {dimension_semantics = [], scalar_prefetch = 0 : i64, scratch_operands = 0 : i64, tpu.core_type = #tpu.core_type<tc>} {
    %c0 = arith.constant 0 : index
    %c0_0 = arith.constant 0 : index
    %0 = vector.load %arg0[%c0, %c0_0] : memref<16x4xf32, #tpu.memory_space<vmem>>, vector<16x4xf32>
    %1 = math.absf %0 : vector<16x4xf32>
    %cst = arith.constant 0x7F800000 : f32
    %2 = vector.broadcast %cst : f32 to vector<16x4xf32>
    %3 = arith.cmpf olt, %1, %2 : vector<16x4xf32>
    %4 = arith.extui %3 : vector<16x4xi1> to vector<16x4xi32>
    %5 = arith.sitofp %4 : vector<16x4xi32> to vector<16x4xf32>
    %cst_1 = arith.constant dense<0x7F800000> : vector<4xf32>
    %6 = vector.multi_reduction <minimumf>, %5, %cst_1 [0] : vector<16x4xf32> to vector<4xf32>
    %7 = vector.shape_cast %6 : vector<4xf32> to vector<1x4xf32>
    %cst_2 = arith.constant dense<0x7F800000> : vector<1xf32>
    %8 = vector.multi_reduction <minimumf>, %7, %cst_2 [1] : vector<1x4xf32> to vector<1xf32>
    %9 = vector.shape_cast %8 : vector<1xf32> to vector<1x1xf32>
    %c0_3 = arith.constant 0 : index
    %c0_4 = arith.constant 0 : index
    %10 = vector.load %arg4[%c0_3, %c0_4] : memref<1x1xf32, #tpu.memory_space<vmem>>, vector<1x1xf32>
    tpu.vector_store %arg4[%c0_3, %c0_4], %9 {strides = array<i32>} : memref<1x1xf32, #tpu.memory_space<vmem>>, vector<1x1xf32>,
    %11 = tpu.iota {dimensions = array<i32: 0>} : vector<16x1xi32>
    %c8_i32 = arith.constant 8 : i32
    %c0_i32 = arith.constant 0 : i32
    %12 = arith.cmpi eq, %c8_i32, %c0_i32 : i32
    %c1_i32 = arith.constant 1 : i32
    %13 = arith.select %12, %c1_i32, %c8_i32 : i32
    %14 = vector.broadcast %13 : i32 to vector<16x1xi32>
    %15 = arith.remsi %11, %14 : vector<16x1xi32>
    %c0_i32_5 = arith.constant 0 : i32
    %16 = vector.broadcast %c0_i32_5 : i32 to vector<16x1xi32>
    %17 = arith.cmpi ne, %15, %16 : vector<16x1xi32>
    %c0_i32_6 = arith.constant 0 : i32
    %18 = vector.broadcast %c0_i32_6 : i32 to vector<16x1xi32>
    %19 = arith.cmpi slt, %15, %18 : vector<16x1xi32>
    %c0_i32_7 = arith.constant 0 : i32
    %20 = arith.cmpi slt, %13, %c0_i32_7 : i32
    %21 = vector.broadcast %20 : i1 to vector<16x1xi1>
    %22 = vector.broadcast %21 : vector<16x1xi1> to vector<16x1xi1>
    %23 = arith.xori %19, %22 : vector<16x1xi1>
    %24 = arith.andi %23, %17 : vector<16x1xi1>
    %25 = vector.broadcast %13 : i32 to vector<16x1xi32>
    %26 = arith.addi %15, %25 : vector<16x1xi32>
    %27 = arith.select %24, %26, %15 : vector<16x1xi1>, vector<16x1xi32>
    %c0_i32_8 = arith.constant 0 : i32
    %28 = vector.broadcast %c0_i32_8 : i32 to vector<16x1xi32>
    %29 = arith.cmpi eq, %27, %28 : vector<16x1xi32>
    %c1_i32_9 = arith.constant 1 : i32
    %30 = tpu.dynamic_rotate %0 by %c1_i32_9 dim 0 : vector<16x4xf32>, i32 -> vector<16x4xf32>
    %cst_10 = arith.constant 0.000000e+00 : f32
    %31 = vector.shape_cast %29 : vector<16x1xi1> to vector<16x1xi1>
    %32 = vector.broadcast %31 : vector<16x1xi1> to vector<16x4xi1>
    %33 = vector.broadcast %cst_10 : f32 to vector<16x4xf32>
    %34 = arith.select %32, %33, %30 : vector<16x4xi1>, vector<16x4xf32>
    %c7_i32 = arith.constant 7 : i32
    %35 = vector.broadcast %c7_i32 : i32 to vector<16x1xi32>
    %36 = arith.cmpi eq, %27, %35 : vector<16x1xi32>
    %c15_i32 = arith.constant 15 : i32
    %37 = tpu.dynamic_rotate %0 by %c15_i32 dim 0 : vector<16x4xf32>, i32 -> vector<16x4xf32>
    %cst_11 = arith.constant 0.000000e+00 : f32
    %38 = vector.shape_cast %36 : vector<16x1xi1> to vector<16x1xi1>
    %39 = vector.broadcast %38 : vector<16x1xi1> to vector<16x4xi1>
    %40 = vector.broadcast %cst_11 : f32 to vector<16x4xf32>
    %41 = arith.select %39, %40, %37 : vector<16x4xi1>, vector<16x4xf32>
    %42 = arith.truncf %34 : vector<16x4xf32> to vector<16x4xbf16>
    %c0_12 = arith.constant 0 : index
    %c0_13 = arith.constant 0 : index
    %c0_14 = arith.constant 0 : index
    %43 = vector.load %arg1[%c0_12, %c0_13, %c0_14] : memref<3x4x128xbf16, #tpu.memory_space<vmem>>, vector<1x4x128xbf16>
    %44 = vector.shape_cast %43 : vector<1x4x128xbf16> to vector<4x128xbf16>
    %cst_15 = arith.constant dense<0.000000e+00> : vector<16x128xf32>
    %45 = tpu.matmul %42, %44, %cst_15 {dimension_numbers = #tpu.dot_dimension_numbers<[1], [0], [0], [1], [0, 0, 1, 1], [], []>} : vector<16x4xbf16>, vector<4x128xbf16>, vector<16x128xf32> -> vector<16x128xf32>
    %46 = arith.truncf %0 : vector<16x4xf32> to vector<16x4xbf16>
    %c1 = arith.constant 1 : index
    %c0_16 = arith.constant 0 : index
    %c0_17 = arith.constant 0 : index
    %47 = vector.load %arg1[%c1, %c0_16, %c0_17] : memref<3x4x128xbf16, #tpu.memory_space<vmem>>, vector<1x4x128xbf16>
    %48 = vector.shape_cast %47 : vector<1x4x128xbf16> to vector<4x128xbf16>
    %cst_18 = arith.constant dense<0.000000e+00> : vector<16x128xf32>
    %49 = tpu.matmul %46, %48, %cst_18 {dimension_numbers = #tpu.dot_dimension_numbers<[1], [0], [0], [1], [0, 0, 1, 1], [], []>} : vector<16x4xbf16>, vector<4x128xbf16>, vector<16x128xf32> -> vector<16x128xf32>
    %50 = arith.addf %45, %49 : vector<16x128xf32>
    %51 = arith.truncf %41 : vector<16x4xf32> to vector<16x4xbf16>
    %c2 = arith.constant 2 : index
    %c0_19 = arith.constant 0 : index
    %c0_20 = arith.constant 0 : index
    %52 = vector.load %arg1[%c2, %c0_19, %c0_20] : memref<3x4x128xbf16, #tpu.memory_space<vmem>>, vector<1x4x128xbf16>
    %53 = vector.shape_cast %52 : vector<1x4x128xbf16> to vector<4x128xbf16>
    %cst_21 = arith.constant dense<0.000000e+00> : vector<16x128xf32>
    %54 = tpu.matmul %51, %53, %cst_21 {dimension_numbers = #tpu.dot_dimension_numbers<[1], [0], [0], [1], [0, 0, 1, 1], [], []>} : vector<16x4xbf16>, vector<4x128xbf16>, vector<16x128xf32> -> vector<16x128xf32>
    %55 = arith.addf %50, %54 : vector<16x128xf32>
    %cst_22 = arith.constant dense<0.000000e+00> : vector<128xf32>
    %56 = vector.multi_reduction <add>, %55, %cst_22 [0] : vector<16x128xf32> to vector<128xf32>
    %57 = vector.shape_cast %56 : vector<128xf32> to vector<1x128xf32>
    %cst_23 = arith.constant 6.250000e-02 : f32
    %58 = vector.broadcast %cst_23 : f32 to vector<1x128xf32>
    %59 = arith.mulf %57, %58 : vector<1x128xf32>
    %60 = arith.mulf %55, %55 : vector<16x128xf32>
    %cst_24 = arith.constant dense<0.000000e+00> : vector<128xf32>
    %61 = vector.multi_reduction <add>, %60, %cst_24 [0] : vector<16x128xf32> to vector<128xf32>
    %62 = vector.shape_cast %61 : vector<128xf32> to vector<1x128xf32>
    %cst_25 = arith.constant 6.250000e-02 : f32
    %63 = vector.broadcast %cst_25 : f32 to vector<1x128xf32>
    %64 = arith.mulf %62, %63 : vector<1x128xf32>
    %65 = arith.mulf %59, %59 : vector<1x128xf32>
    %66 = arith.subf %64, %65 : vector<1x128xf32>
    %cst_26 = arith.constant 0.000000e+00 : f32
    %67 = vector.broadcast %cst_26 : f32 to vector<1x128xf32>
    %68 = arith.maximumf %66, %67 : vector<1x128xf32>
    %69 = vector.broadcast %59 : vector<1x128xf32> to vector<16x128xf32>
    %70 = arith.subf %55, %69 : vector<16x128xf32>
    %cst_27 = arith.constant 9.99999974E-6 : f32
    %71 = vector.broadcast %cst_27 : f32 to vector<1x128xf32>
    %72 = arith.addf %68, %71 : vector<1x128xf32>
    %73 = math.rsqrt %72 : vector<1x128xf32>
    %74 = vector.broadcast %73 : vector<1x128xf32> to vector<16x128xf32>
    %75 = arith.mulf %70, %74 : vector<16x128xf32>
    %cst_28 = arith.constant 0.000000e+00 : f32
    %76 = vector.broadcast %cst_28 : f32 to vector<16x128xf32>
    %77 = arith.maximumf %75, %76 : vector<16x128xf32>
    %c0_i32_29 = arith.constant 0 : i32
    %78 = vector.broadcast %c0_i32_29 : i32 to vector<16x1xi32>
    %79 = arith.cmpi eq, %27, %78 : vector<16x1xi32>
    %c1_i32_30 = arith.constant 1 : i32
    %80 = tpu.dynamic_rotate %77 by %c1_i32_30 dim 0 : vector<16x128xf32>, i32 -> vector<16x128xf32>
    %cst_31 = arith.constant 0.000000e+00 : f32
    %81 = vector.shape_cast %79 : vector<16x1xi1> to vector<16x1xi1>
    %82 = vector.broadcast %81 : vector<16x1xi1> to vector<16x128xi1>
    %83 = vector.broadcast %cst_31 : f32 to vector<16x128xf32>
    %84 = arith.select %82, %83, %80 : vector<16x128xi1>, vector<16x128xf32>
    %c7_i32_32 = arith.constant 7 : i32
    %85 = vector.broadcast %c7_i32_32 : i32 to vector<16x1xi32>
    %86 = arith.cmpi eq, %27, %85 : vector<16x1xi32>
    %c15_i32_33 = arith.constant 15 : i32
    %87 = tpu.dynamic_rotate %77 by %c15_i32_33 dim 0 : vector<16x128xf32>, i32 -> vector<16x128xf32>
    %cst_34 = arith.constant 0.000000e+00 : f32
    %88 = vector.shape_cast %86 : vector<16x1xi1> to vector<16x1xi1>
    %89 = vector.broadcast %88 : vector<16x1xi1> to vector<16x128xi1>
    %90 = vector.broadcast %cst_34 : f32 to vector<16x128xf32>
    %91 = arith.select %89, %90, %87 : vector<16x128xi1>, vector<16x128xf32>
    %92 = arith.truncf %84 : vector<16x128xf32> to vector<16x128xbf16>
    %93 = arith.truncf %77 : vector<16x128xf32> to vector<16x128xbf16>
    %94 = arith.truncf %91 : vector<16x128xf32> to vector<16x128xbf16>
    %95 = tpu.concatenate %92, %93, %94 in 1 : vector<16x128xbf16>, vector<16x128xbf16>, vector<16x128xbf16> -> vector<16x384xbf16>
    %c0_35 = arith.constant 0 : index
    %c0_36 = arith.constant 0 : index
    %96 = vector.load %arg2[%c0_35, %c0_36] : memref<384x128xbf16, #tpu.memory_space<vmem>>, vector<384x128xbf16>
    %cst_37 = arith.constant dense<0.000000e+00> : vector<16x128xf32>
    %97 = tpu.matmul %95, %96, %cst_37 {dimension_numbers = #tpu.dot_dimension_numbers<[1], [0], [0], [1], [0, 0, 1, 1], [], []>} : vector<16x384xbf16>, vector<384x128xbf16>, vector<16x128xf32> -> vector<16x128xf32>
    %cst_38 = arith.constant dense<0.000000e+00> : vector<128xf32>
    %98 = vector.multi_reduction <add>, %97, %cst_38 [0] : vector<16x128xf32> to vector<128xf32>
    %99 = vector.shape_cast %98 : vector<128xf32> to vector<1x128xf32>
    %cst_39 = arith.constant 6.250000e-02 : f32
    %100 = vector.broadcast %cst_39 : f32 to vector<1x128xf32>
    %101 = arith.mulf %99, %100 : vector<1x128xf32>
    %102 = arith.mulf %97, %97 : vector<16x128xf32>
    %cst_40 = arith.constant dense<0.000000e+00> : vector<128xf32>
    %103 = vector.multi_reduction <add>, %102, %cst_40 [0] : vector<16x128xf32> to vector<128xf32>
    %104 = vector.shape_cast %103 : vector<128xf32> to vector<1x128xf32>
    %cst_41 = arith.constant 6.250000e-02 : f32
    %105 = vector.broadcast %cst_41 : f32 to vector<1x128xf32>
    %106 = arith.mulf %104, %105 : vector<1x128xf32>
    %107 = arith.mulf %101, %101 : vector<1x128xf32>
    %108 = arith.subf %106, %107 : vector<1x128xf32>
    %cst_42 = arith.constant 0.000000e+00 : f32
    %109 = vector.broadcast %cst_42 : f32 to vector<1x128xf32>
    %110 = arith.maximumf %108, %109 : vector<1x128xf32>
    %111 = vector.broadcast %101 : vector<1x128xf32> to vector<16x128xf32>
    %112 = arith.subf %97, %111 : vector<16x128xf32>
    %cst_43 = arith.constant 9.99999974E-6 : f32
    %113 = vector.broadcast %cst_43 : f32 to vector<1x128xf32>
    %114 = arith.addf %110, %113 : vector<1x128xf32>
    %115 = math.rsqrt %114 : vector<1x128xf32>
    %116 = vector.broadcast %115 : vector<1x128xf32> to vector<16x128xf32>
    %117 = arith.mulf %112, %116 : vector<16x128xf32>
    %cst_44 = arith.constant 0.000000e+00 : f32
    %118 = vector.broadcast %cst_44 : f32 to vector<16x128xf32>
    %119 = arith.maximumf %117, %118 : vector<16x128xf32>
    %120 = vector.shape_cast %119 : vector<16x128xf32> to vector<2x8x128xf32>
    %cst_45 = arith.constant dense<0.000000e+00> : vector<2x128xf32>
    %121 = vector.multi_reduction <add>, %120, %cst_45 [1] : vector<2x8x128xf32> to vector<2x128xf32>
    %cst_46 = arith.constant 8.000000e+00 : f32
    %122 = vector.broadcast %cst_46 : f32 to vector<2x128xf32>
    %123 = arith.divf %121, %122 : vector<2x128xf32>
    %c0_47 = arith.constant 0 : index
    %c0_48 = arith.constant 0 : index
    %124 = vector.load %arg3[%c0_47, %c0_48] : memref<2x128xf32, #tpu.memory_space<vmem>>, vector<2x128xf32>
    tpu.vector_store %arg3[%c0_47, %c0_48], %123 {strides = array<i32>} : memref<2x128xf32, #tpu.memory_space<vmem>>, vector<2x128xf32>,
    return
  }
}

</mosaic_0001>

<bundles_post_ra>
// kernel: _cnn_encoder_forward.1
= control target key start
LH: loop header
LB: loop body
LE: loop exit
PB: predicated region body
PF: predicated region fallthrough
CT: control target
= control target key end

     0   :  { %10 = vsyncpa [#allocation3], 0  ;;  %vm105_vm0 = vcmask 1041408   ;;  %v44_v3 = vlaneseq  ;;  %vm29_vm1 = vcmask 31744   ;;  %s968_s0 = inlined_call_operand.vmem [shape: f32[16,4], index: 0, kind: input, shape index: {}]   ;;  %s969_s1 = inlined_call_operand.vmem [shape: bf16[3,4,128], index: 1, kind: input, shape index: {}]   ;;  %s970_s2 = inlined_call_operand.vmem [shape: bf16[384,128], index: 2, kind: input, shape index: {}]   ;;  %s971_s3 = inlined_call_operand.hbm [shape: f32[2,128], index: 3, kind: output, shape index: {0}]   ;;  %s972_s4 = inlined_call_operand.hbm [shape: f32[1,1], index: 4, kind: output, shape index: {1}]  }
   0x1   :  { %v575_v0 = vld [vmem:[%s969_s1 + $0x2] sm:$0x3]  ;;  %v802_v2 = vld [vmem:[%s968_s0 + $0x8] sm:$0xff]  ;;  %v578_v6 = vld [vmem:[%s969_s1 + $0x4] sm:$0x3] }
   0x2   :  { %v797_v1 = vld [vmem:[%s968_s0] sm:$0xff]  ;;  %v107_v4 = vsel %vm105_vm0, %v575_v0, 0  ;;  %v150_v7 = vsel %vm105_vm0, %v578_v6, 0  ;;  %v812_v9 = vshrl.u32 %v44_v3, 7  ;;  %v74_v11 = vrot.slane %v802_v2, 7 }
   0x3   :  { %v99_v5 = vpack.c.bf16 %v802_v2, %v797_v1  ;;  %116 = vmatpush.bf16.msra.mxu2 %v107_v4  ;;  %v98_v8 = vld [vmem:[%s969_s1] sm:$0x3]  ;;  %v73_v10 = vrot.slane %v797_v1, 7 }
   0x4   :  { %v127_v12 = vsel %vm105_vm0, %v98_v8, 0 }
   0x7   :  { %159 = vmatpush.bf16.msrb.mxu2 %v150_v7 }
   0x8   :  { %11 = vsyncpa [#allocation5], 0  ;;  %136 = vmatpush.bf16.msra.mxu1 %v127_v12  ;;  %v46_v13 = vadd.s32 8, %v812_v9  ;;  %v51_v14 = vand.u32 7, %v812_v9  ;;  %vm75_vm2 = vcmp.lt.s32.totalorder %v812_v9, 1  ;;  %576 = vmatmul.msk.bf16.vlgmr.msra.gmra.mxu2 %vm29_vm1, %v99_v5  ;;  %v86_v19 = vrot.slane %v797_v1, 1 }
   0x9   :  { %v77_v15 = vsel %vm75_vm2, %v74_v11, %v73_v10  ;;  %v76_v18 = vsel %vm75_vm2, %v73_v10, %v74_v11  ;;  %v87_v20 = vrot.slane %v802_v2, 1  ;;  %vm88_vm5 = vcmp.lt.s32.totalorder %v812_v9, 7  ;;  %v691_v35 = vld [vmem:[%s970_s2 + $0x78] sm:$0xff]  ;;  %v690_v38 = vld [vmem:[%s970_s2 + $0x70] sm:$0xff]  ;;  %v689_v43 = vld [vmem:[%s970_s2 + $0x68] sm:$0xff]  ;;  %s559_s20 = sshll.u32 %s972_s4, 4  ;;  %s560_s20 = int_to_ptr.hbm [resolvable:$true] %s559_s20 }
   0xa   :  { %v58_v16 = vand.u32 7, %v46_v13  ;;  %vm822_vm3 = vcmp.eq.s32.totalorder %v51_v14, 0  ;;  %vm839_vm6 = vcmp.eq.s32.totalorder %v51_v14, 7  ;;  %448 = vmatpush.bf16.msra.mxu0 %v691_v35  ;;  %v683_v37 = vld [vmem:[%s970_s2 + $0x38] sm:$0xff]  ;;  %v682_v42 = vld [vmem:[%s970_s2 + $0x30] sm:$0xff]  ;;  %v681_v49 = vld [vmem:[%s970_s2 + $0x28] sm:$0xff] }
   0xb   :  { %v82_v21 = vsel %vm822_vm3, 0.0, %v77_v15  ;;  %v89_v27 = vsel %vm88_vm5, %v86_v19, %v87_v20  ;;  %v90_v28 = vsel %vm88_vm5, %v87_v20, %v86_v19  ;;  %v699_v39 = vld [vmem:[%s970_s2 + $0xb8] sm:$0xff]  ;;  %434 = vmatpush.bf16.msra.mxu3 %v683_v37  ;;  %v698_v44 = vld [vmem:[%s970_s2 + $0xb0] sm:$0xff]  ;;  %v688_v50 = vld [vmem:[%s970_s2 + $0x60] sm:$0xff]  ;;  %vm42_vm13 = vcmask 0   ;;  %s765_s4 = smov [#allocation2]  }
   0xc   :  { %vm832_vm4 = vcmp.eq.s32.totalorder %v58_v16, 0  ;;  %vm843_vm7 = vcmp.eq.s32.totalorder %v58_v16, 7  ;;  %v95_v29 = vsel %vm839_vm6, 0.0, %v89_v27  ;;  %462 = vmatpush.bf16.msrb.mxu1 %v699_v39  ;;  %v697_v51 = vld [vmem:[%s970_s2 + $0xa8] sm:$0xff]  ;;  %v680_v57 = vld [vmem:[%s970_s2 + $0x20] sm:$0xff]  ;;  %v687_v58 = vld [vmem:[%s970_s2 + $0x58] sm:$0xff] }
   0xd   :  { %v83_v23 = vsel %vm832_vm4, 0.0, %v76_v18  ;;  %v96_v30 = vsel %vm843_vm7, 0.0, %v90_v28  ;;  %v696_v59 = vld [vmem:[%s970_s2 + $0xa0] sm:$0xff]  ;;  %v679_v0 = vld [vmem:[%s970_s2 + $0x18] sm:$0xff]  ;;  %v686_v3 = vld [vmem:[%s970_s2 + $0x50] sm:$0xff]  ;;  %s546_s21 = sshll.u32 %s765_s4, 4  ;;  %s547_s21 = int_to_ptr.vmem [resolvable:$true] %s546_s21 }
   0xe   :  { %v97_v24 = vpack.c.bf16 %v83_v23, %v82_v21  ;;  %v143_v31 = vpack.c.bf16 %v96_v30, %v95_v29  ;;  %449 = vmatpush.bf16.msra.mxu0 %v690_v38  ;;  %v695_v4 = vld [vmem:[%s970_s2 + $0x98] sm:$0xff]  ;;  %v678_v10 = vld [vmem:[%s970_s2 + $0x10] sm:$0xff]  ;;  %v685_v11 = vld [vmem:[%s970_s2 + $0x48] sm:$0xff]  ;;  %s548_s24 = sshll.u32 %s971_s3, 4  ;;  %s549_s24 = int_to_ptr.hbm [resolvable:$true] %s548_s24 }
   0xf   :  { %435 = vmatpush.bf16.msra.mxu3 %v682_v42  ;;  %v694_v12 = vld [vmem:[%s970_s2 + $0x90] sm:$0xff]  ;;  %v677_v18 = vld [vmem:[%s970_s2 + $0x8] sm:$0xff]  ;;  %v684_v19 = vld [vmem:[%s970_s2 + $0x40] sm:$0xff] }
  0x10   :  { %577 = vmatmul.msk.bf16.vlgmr.msra.gmra.mxu1 %vm29_vm1, %v97_v24  ;;  %v693_v20 = vld [vmem:[%s970_s2 + $0x88] sm:$0xff]  ;;  %v676_v27 = vld [vmem:[%s970_s2] sm:$0xff] }
  0x11   :  { %463 = vmatpush.bf16.msrb.mxu1 %v698_v44  ;;  %v692_v28 = vld [vmem:[%s970_s2 + $0x80] sm:$0xff]  ;;  %s763_s2 = smov [#allocation4]  }
  0x12   :  { %450 = vmatpush.bf16.msra.mxu0 %v689_v43  ;;  %s557_s17 = sshll.u32 %s763_s2, 4  ;;  %s558_s17 = int_to_ptr.vmem [resolvable:$true] %s557_s17 }
  0x13   :  { %436 = vmatpush.bf16.msra.mxu3 %v681_v49 }
  0x15   :  { %464 = vmatpush.bf16.msrb.mxu1 %v697_v51 }
  0x16   :  { %451 = vmatpush.bf16.msra.mxu0 %v688_v50 }
  0x17   :  { %437 = vmatpush.bf16.msra.mxu3 %v680_v57 }
  0x18   :  { %579 = vmatmul.msk.bf16.vlgmr.msrb.gmra.mxu2 %vm29_vm1, %v143_v31  ;;  %v21_v31 = vand.u32 2147483647, %v797_v1 }
  0x19   :  { %465 = vmatpush.bf16.msrb.mxu1 %v696_v59 }
  0x1a   :  { %452 = vmatpush.bf16.msra.mxu0 %v687_v58  ;;  %vm23_vm8 = vcmp.lt.f32.partialorder %v21_v31, inf }
  0x1b   :  { %438 = vmatpush.bf16.msra.mxu3 %v679_v0 }
  0x1d   :  { %466 = vmatpush.bf16.msrb.mxu1 %v695_v4 }
  0x1e   :  { %453 = vmatpush.bf16.msra.mxu0 %v686_v3 }
  0x1f   :  { %439 = vmatpush.bf16.msra.mxu3 %v678_v10 }
  0x21   :  { %467 = vmatpush.bf16.msrb.mxu1 %v694_v12 }
  0x22   :  { %454 = vmatpush.bf16.msra.mxu0 %v685_v11 }
  0x23   :  { %440 = vmatpush.bf16.msra.mxu3 %v677_v18 }
  0x25   :  { %468 = vmatpush.bf16.msrb.mxu1 %v693_v20 }
  0x26   :  { %455 = vmatpush.bf16.msra.mxu0 %v684_v19 }
  0x27   :  { %441 = vmatpush.bf16.msra.mxu3 %v676_v27 }
  0x29   :  { %469 = vmatpush.bf16.msrb.mxu1 %v692_v28 }
  0x8b   :  { %v118_v32 = vpop.f32.mrf.mxu2 }
  0x8d   :  { %v138_v34 = vpop.f32.mrf.mxu1 }
  0x8e   :  { %v139_v41 = vadd.f32 %v138_v34, %v118_v32  ;;  %v22_v32 = vand.u32 2147483647, %v802_v2 }
  0x90   :  { %vm24_vm9 = vcmp.lt.f32.partialorder %v22_v32, inf }
  0x93   :  { %v120_v33 = vpop.f32.mrf.mxu2 }
  0x95   :  { %v140_v40 = vpop.f32.mrf.mxu1 }
  0x96   :  { %v141_v45 = vadd.f32 %v140_v40, %v120_v33  ;;  %v762_v33 = vmov 0.0  }
  0x97   :  { %v573_v34 = vsel %vm23_vm8, 1.0, %v762_v33  ;;  %v574_v35 = vsel %vm24_vm9, 1.0, %v762_v33 }
  0x98   :  { %v30_v37 = vsel %vm29_vm1, %v573_v34, inf  ;;  %v31_v38 = vsel %vm29_vm1, %v574_v35, inf }
  0x99   :  { %v32_v40 = vmin.f32 %v30_v37, %v31_v38 }
  0x9b   :  { %v161_v36 = vpop.f32.mrf.mxu2  ;;  %v33_v42 = vrot.slane %v32_v40, 4 }
  0x9c   :  { %v878_v46 = vadd.f32 %v161_v36, %v139_v41 }
  0x9d   :  { %v34_v44 = vmin.f32 %v32_v40, %v33_v42 }
  0x9e   :  { %v176_v52 = vmul.f32 %v878_v46, %v878_v46 }
  0x9f   :  { %v35_v1 = vrot.slane %v34_v44, 2 }
  0xa3   :  { %v163_v47 = vpop.f32.mrf.mxu2 }
  0xa4   :  { %v880_v48 = vadd.f32 %v163_v47, %v141_v45  ;;  %v36_v47 = vmin.f32 %v34_v44, %v35_v1 }
  0xa6   :  { %v168_v53 = vadd.f32 %v880_v48, %v878_v46  ;;  %v177_v54 = vmul.f32 %v880_v48, %v880_v48 }
  0xa8   :  { %v169_v55 = vrot.slane %v168_v53, 4  ;;  %v178_v56 = vadd.f32 %v177_v54, %v176_v52  ;;  %v37_v52 = vrot.slane %v36_v47, 1 }
  0xaa   :  { %v170_v60 = vadd.f32 %v169_v55, %v168_v53  ;;  %v179_v61 = vrot.slane %v178_v56, 4  ;;  %v38_v55 = vmin.f32 %v36_v47, %v37_v52 }
  0xac   :  { %v171_v62 = vrot.slane %v170_v60, 2  ;;  %v180_v63 = vadd.f32 %v179_v61, %v178_v56  ;;  %v39_v58 = vsel %vm29_vm1, %v38_v55, inf }
  0xad   :  { %40 = vmin.xlane.f32.xlu0 %v39_v58 }
  0xae   :  { %v172_v5 = vadd.f32 %v171_v62, %v170_v60  ;;  %v181_v6 = vrot.slane %v180_v63, 2 }
  0xb0   :  { %v173_v7 = vrot.slane %v172_v5, 1  ;;  %v182_v8 = vadd.f32 %v181_v6, %v180_v63 }
  0xb2   :  { %v174_v13 = vadd.f32 %v173_v7, %v172_v5  ;;  %v183_v14 = vrot.slane %v182_v8, 1 }
  0xb4   :  { %v175_v15 = vmul.f32 0.0625, %v174_v13  ;;  %v184_v16 = vadd.f32 %v183_v14, %v182_v8 }
  0xb6   :  { %v185_v21 = vmul.f32 0.0625, %v184_v16  ;;  %v186_v23 = vmul.f32 %v175_v15, %v175_v15  ;;  %v190_v49 = vsub.f32 %v880_v48, %v175_v15  ;;  %v189_v50 = vsub.f32 %v878_v46, %v175_v15 }
  0xb8   :  { %v187_v24 = vsub.f32 %v185_v21, %v186_v23 }
  0xba   :  { %v188_v29 = vmax.f32 %v187_v24, 0.0 }
  0xbc   :  { %v191_v30 = vadd.f32 1e-05, %v188_v29 }
  0xbe   :  { %704 = vrsqrt.f32 %v191_v30  ;;  %vm198_vm11 = vweird.f32 %v191_v30 }
  0xc4   :  { %v705_v36 = vpop.eup %704 }
  0xc5   :  { %v193_v39 = vmul.f32 %v705_v36, %v191_v30  ;;  %vm199_vm10 = vweird.f32 %v705_v36 }
  0xc6   :  { %vm200_vm12 = vmor %vm198_vm11, %vm199_vm10 }
  0xc7   :  { %v194_v41 = vmul.f32 %v705_v36, %v193_v39 }
  0xc9   :  { %v195_v43 = vmul.f32 0.5, %v194_v41 }
  0xcb   :  { %v196_v45 = vsub.f32 1.5, %v195_v43 }
  0xcd   :  { %v197_v2 = vmul.f32 %v705_v36, %v196_v45 }
  0xcf   :  { %v201_v51 = vsel %vm200_vm12, %v705_v36, %v197_v2 }
  0xd0   :  { %v203_v53 = vmul.f32 %v201_v51, %v190_v49  ;;  %v202_v54 = vmul.f32 %v201_v51, %v189_v50 }
  0xd2   :  { %v205_v56 = vmax.f32 %v203_v53, 0.0  ;;  %v204_v57 = vmax.f32 %v202_v54, 0.0 }
  0xd4   :  { %v213_v59 = vrot.slane %v205_v56, 1  ;;  %v220_v60 = vpack.c.bf16 %v204_v57, %v204_v57  ;;  %v221_v61 = vpack.c.bf16 %v205_v56, %v205_v56  ;;  %v206_v62 = vrot.slane %v204_v57, 7 }
  0xd5   :  { %v207_v63 = vrot.slane %v205_v56, 7  ;;  %v212_v0 = vrot.slane %v204_v57, 1  ;;  %v764_v56 = vmov 8.0  }
  0xd6   :  { %v232_v48 = vunpack.c.l.b16 %v220_v60  ;;  %v233_v3 = vunpack.c.l.b16 %v221_v61 }
  0xd7   :  { %v208_v46 = vsel %vm75_vm2, %v206_v62, %v207_v63  ;;  %v209_v4 = vsel %vm75_vm2, %v207_v63, %v206_v62  ;;  %v214_v5 = vsel %vm88_vm5, %v212_v0, %v213_v59  ;;  %v215_v6 = vsel %vm88_vm5, %v213_v59, %v212_v0 }
  0xd8   :  { %v234_v7 = vpack.c.b16 %v233_v3, %v232_v48  ;;  %v210_v8 = vsel %vm822_vm3, 0.0, %v209_v4  ;;  %v211_v10 = vsel %vm832_vm4, 0.0, %v208_v46  ;;  %v216_v11 = vsel %vm839_vm6, 0.0, %v214_v5 }
  0xd9   :  { %v218_v12 = vpack.c.bf16 %v210_v8, %v210_v8  ;;  %v219_v13 = vpack.c.bf16 %v211_v10, %v211_v10  ;;  %v217_v14 = vsel %vm843_vm7, 0.0, %v215_v6  ;;  %v222_v15 = vpack.c.bf16 %v216_v11, %v216_v11 }
  0xda   :  { %456 = vmatmul.bf16.vlgmr.msra.gmra.mxu0 %v234_v7  ;;  %v223_v16 = vpack.c.bf16 %v217_v14, %v217_v14  ;;  %vm537_vm2 = vcmask 1041409  }
  0xdb   :  { %v226_v9 = vunpack.c.l.b16 %v218_v12  ;;  %v227_v18 = vunpack.c.l.b16 %v219_v13  ;;  %v238_v19 = vunpack.c.l.b16 %v222_v15 }
  0xdc   :  { %v239_v20 = vunpack.c.l.b16 %v223_v16 }
  0xdd   :  { %v228_v17 = vpack.c.b16 %v227_v18, %v226_v9 }
  0xde   :  { %v240_v21 = vpack.c.b16 %v239_v20, %v238_v19 }
  0xdf   :  { %442 = vmatmul.bf16.vlgmr.msra.gmra.mxu3 %v228_v17 }
  0xe0   :  { %470 = vmatmul.bf16.vlgmr.msrb.gmra.mxu1 %v240_v21 }
 0x120   :  { %v41_v51 = vpop.xlane.xlu0 %40 }
 0x121   :  { %43 = vst.msk [vmem:[#allocation4] sm:$0x1] %vm42_vm13, %v41_v51 }
 0x122   :  { %562 = dma.vmem_to_hbm [thread:$0]  %s558_s17, 16, %s560_s20, [#allocation5]  }
 0x157   :  { %v457_v22 = vpop.f32.mrf.mxu0 }
 0x15d   :  { %v471_v23 = vpop.f32.mrf.mxu1 }
 0x15f   :  { %v459_v27 = vpop.f32.mrf.mxu0 }
 0x162   :  { %v443_v25 = vpop.f32.mrf.mxu3 }
 0x163   :  { %v458_v24 = vadd.f32 %v457_v22, %v443_v25 }
 0x165   :  { %v472_v29 = vadd.f32 %v471_v23, %v458_v24  ;;  %v473_v30 = vpop.f32.mrf.mxu1 }
 0x167   :  { %v484_v32 = vmul.f32 %v472_v29, %v472_v29 }
 0x16a   :  { %v445_v28 = vpop.f32.mrf.mxu3 }
 0x16b   :  { %v460_v26 = vadd.f32 %v459_v27, %v445_v28 }
 0x16d   :  { %v474_v31 = vadd.f32 %v473_v30, %v460_v26 }
 0x16f   :  { %v476_v33 = vadd.f32 %v474_v31, %v472_v29  ;;  %v485_v34 = vmul.f32 %v474_v31, %v474_v31 }
 0x171   :  { %v477_v35 = vrot.slane %v476_v33, 4  ;;  %v486_v36 = vadd.f32 %v485_v34, %v484_v32 }
 0x173   :  { %v478_v37 = vadd.f32 %v477_v35, %v476_v33  ;;  %v487_v38 = vrot.slane %v486_v36, 4 }
 0x175   :  { %v479_v39 = vrot.slane %v478_v37, 2  ;;  %v488_v40 = vadd.f32 %v487_v38, %v486_v36 }
 0x177   :  { %v480_v41 = vadd.f32 %v479_v39, %v478_v37  ;;  %v489_v42 = vrot.slane %v488_v40, 2 }
 0x179   :  { %v481_v43 = vrot.slane %v480_v41, 1  ;;  %v490_v44 = vadd.f32 %v489_v42, %v488_v40 }
 0x17b   :  { %v482_v45 = vadd.f32 %v481_v43, %v480_v41  ;;  %v491_v1 = vrot.slane %v490_v44, 1 }
 0x17d   :  { %v483_v2 = vmul.f32 0.0625, %v482_v45  ;;  %v492_v47 = vadd.f32 %v491_v1, %v490_v44 }
 0x17f   :  { %v493_v49 = vmul.f32 0.0625, %v492_v47  ;;  %v494_v50 = vmul.f32 %v483_v2, %v483_v2  ;;  %v497_v0 = vsub.f32 %v472_v29, %v483_v2  ;;  %v498_v48 = vsub.f32 %v474_v31, %v483_v2 }
 0x181   :  { %v495_v52 = vsub.f32 %v493_v49, %v494_v50 }
 0x183   :  { %v496_v53 = vmax.f32 %v495_v52, 0.0 }
 0x185   :  { %v499_v54 = vadd.f32 1e-05, %v496_v53 }
 0x187   :  { %706 = vrsqrt.f32 %v499_v54  ;;  %vm506_vm15 = vweird.f32 %v499_v54 }
 0x188   :  { %708 = vrcp.f32 %v764_v56 }
 0x18d   :  { %v707_v55 = vpop.eup %706 }
 0x18e   :  { %v501_v57 = vmul.f32 %v707_v55, %v499_v54  ;;  %v709_v60 = vpop.eup %708  ;;  %vm507_vm14 = vweird.f32 %v707_v55 }
 0x18f   :  { %v527_v63 = vmul.f32 8.0, %v709_v60  ;;  %vm508_vm0 = vmor %vm506_vm15, %vm507_vm14  ;;  %vm531_vm1 = vweird.f32 %v709_v60 }
 0x190   :  { %v502_v58 = vmul.f32 %v707_v55, %v501_v57 }
 0x191   :  { %v528_v5 = vsub.f32 1.0, %v527_v63 }
 0x192   :  { %v503_v59 = vmul.f32 0.5, %v502_v58 }
 0x193   :  { %v529_v11 = vmul.f32 %v709_v60, %v528_v5 }
 0x194   :  { %v504_v61 = vsub.f32 1.5, %v503_v59 }
 0x195   :  { %v530_v16 = vadd.f32 %v709_v60, %v529_v11 }
 0x196   :  { %v505_v62 = vmul.f32 %v707_v55, %v504_v61 }
 0x197   :  { %v532_v17 = vsel %vm531_vm1, %v709_v60, %v530_v16 }
 0x198   :  { %v509_v3 = vsel %vm508_vm0, %v707_v55, %v505_v62 }
 0x199   :  { %v510_v46 = vmul.f32 %v509_v3, %v497_v0  ;;  %v511_v4 = vmul.f32 %v509_v3, %v498_v48 }
 0x19b   :  { %v512_v6 = vmax.f32 %v510_v46, 0.0  ;;  %v513_v7 = vmax.f32 %v511_v4, 0.0 }
 0x19d   :  { %v514_v8 = vrot.slane %v512_v6, 4  ;;  %v520_v10 = vrot.slane %v513_v7, 4 }
 0x19f   :  { %v521_v12 = vadd.f32 %v520_v10, %v513_v7  ;;  %v515_v13 = vadd.f32 %v514_v8, %v512_v6 }
 0x1a1   :  { %v516_v14 = vrot.slane %v515_v13, 2  ;;  %v522_v15 = vrot.slane %v521_v12, 2 }
 0x1a3   :  { %v517_v9 = vadd.f32 %v516_v14, %v515_v13  ;;  %v523_v18 = vadd.f32 %v522_v15, %v521_v12 }
 0x1a5   :  { %v518_v19 = vrot.slane %v517_v9, 1  ;;  %v524_v20 = vrot.slane %v523_v18, 1 }
 0x1a7   :  { %v519_v21 = vadd.f32 %v518_v19, %v517_v9  ;;  %v525_v22 = vadd.f32 %v524_v20, %v523_v18 }
 0x1a9   :  { %v533_v23 = vmul.f32 %v532_v17, %v519_v21  ;;  %v534_v25 = vmul.f32 %v532_v17, %v525_v22 }
 0x1ab   :  { %v538_v24 = vsel %vm537_vm2, %v534_v25, %v533_v23 }
 0x1ac   :  { %540 = vst [vmem:[#allocation2] sm:$0x3] %v538_v24 }
 0x1ad   :  { %551 = dma.vmem_to_hbm [thread:$0]  %s547_s21, 32, %s549_s24, [#allocation3]  }
 0x1ae   :  { %758 = dma.done.wait [#allocation3], 32  }
 0x1af   :  { %759 = vsyncadd [#allocation3], 4294967264 }
 0x1b0   :  { %760 = dma.done.wait [#allocation5], 16  }
 0x1b1   :  { %761 = vsyncadd [#allocation5], 4294967280 }
 0x1b2   :  { %571 = vsyncpa [#allocation3], 1 }
 0x1b3   :  { %572 = vsyncpa [#allocation5], 1 }

</bundles_post_ra>
